<compile_context>
chip_gen: v6e
topology: v6e:2x2x1
jax: 0.10.0
libtpu: 0.0.40
codegen_flags: <defaults>
</compile_context>

<pallas_src>
import functools

import jax
import jax.numpy as jnp
from jax import lax
from jax.experimental import pallas as pl
from jax.experimental.pallas import tpu as pltpu


def _round_up(x, m):
    return (x + m - 1) // m * m


def _tcs_kernel(*refs, K, dilation, l_tile, L, HB, left, right, off0, c_chunk,
                multi):
    if multi:
        xc_ref, xl_ref, xr_ref, wdw_ref, wpw_ref, o_ref, win_ref = refs
    else:
        xc_ref, wdw_ref, wpw_ref, o_ref, win_ref = refs
        xl_ref = xr_ref = None

    t = pl.program_id(1)
    T = pl.num_programs(1)
    C_in = wdw_ref.shape[0]

    # ---- Assemble the window [left halo | center | right halo] in VMEM. ------
    # Center tile stored at a 128-aligned lane offset (unmasked bulk store).
    # The ragged last tile's stale columns (global index >= L) are zeroed so
    # 'same' zero-padding semantics hold for outputs near the sequence end.
    if multi and (L % l_tile != 0):
        @pl.when(t == T - 1)
        def _():
            col = lax.broadcasted_iota(jnp.int32, (1, l_tile), 1) + t * l_tile
            win_ref[:, off0:off0 + l_tile] = jnp.where(col < L, xc_ref[0], 0)

        @pl.when(t < T - 1)
        def _():
            win_ref[:, off0:off0 + l_tile] = xc_ref[0]
    else:
        win_ref[:, off0:off0 + l_tile] = xc_ref[0]

    # Left halo: last `left` columns of the previous 128-column slab.
    # Global columns < 0 are the 'same' zero padding (mask handles t == 0).
    if left > 0:
        if multi:
            col = lax.broadcasted_iota(jnp.int32, (1, left), 1) + t * l_tile - left
            win_ref[:, off0 - left:off0] = jnp.where(
                col >= 0, xl_ref[0, :, HB - left:], 0)
        else:
            win_ref[:, off0 - left:off0] = jnp.zeros((C_in, left), win_ref.dtype)

    # Right halo: first `right` columns of the next 128-column slab.
    # Global columns >= L are the 'same' zero padding (mask handles the last tile).
    if right > 0:
        if multi:
            col = lax.broadcasted_iota(jnp.int32, (1, right), 1) + (t + 1) * l_tile
            win_ref[:, off0 + l_tile:off0 + l_tile + right] = jnp.where(
                col < L, xr_ref[0, :, :right], 0)
        else:
            win_ref[:, off0 + l_tile:off0 + l_tile + right] = jnp.zeros(
                (C_in, right), win_ref.dtype)

    # ---- Depthwise (VPU, f32 acc) + pointwise 1x1 (MXU bf16, f32 acc). -------
    # Channel chunking bounds the live f32 accumulator (no full C_in x l_tile
    # f32 spill at QuartzNet channel counts) and interleaves VPU and MXU work.
    base = off0 - left
    y = None
    for c0 in range(0, C_in, c_chunk):
        c1 = min(c0 + c_chunk, C_in)
        acc = (wdw_ref[c0:c1, 0:1] *
               win_ref[c0:c1, base:base + l_tile].astype(jnp.float32))
        for k in range(1, K):
            s = base + k * dilation
            acc = acc + (wdw_ref[c0:c1, k:k + 1] *
                         win_ref[c0:c1, s:s + l_tile].astype(jnp.float32))
        part = jnp.dot(wpw_ref[:, c0:c1], acc.astype(jnp.bfloat16),
                       preferred_element_type=jnp.float32)
        y = part if y is None else y + part

    o_ref[0] = y.astype(o_ref.dtype)


def time_channel_separable_conv(x, w_dw, w_pw, *, dilation=1, l_tile=None):
    """x: (N, C_in, L); w_dw: (C_in, K); w_pw: (C_out, C_in) -> (N, C_out, L)."""
    N, C_in, L = x.shape
    C_out = w_pw.shape[0]
    K = w_dw.shape[1]

    # PyTorch Conv1d(padding='same'): total = dilation*(K-1), left = total//2.
    halo = dilation * (K - 1)
    left = halo // 2
    right = halo - left

    HB = _round_up(max(left, right, 1), 128)  # halo slab width (lane-dense)
    off0 = _round_up(left, 128)               # 128-aligned start of the center
    c_chunk = 256
    in_bytes = jnp.dtype(x.dtype).itemsize

    # VMEM budget: v7x has 64 MiB (32 MiB scoped default) vs 128 MiB on
    # v5e/v6e (16 / 32 MiB scoped defaults). Derive l_tile from the real
    # capacity and raise vmem_limit_bytes explicitly.
    try:
        vmem_cap = int(pltpu.get_tpu_info().vmem_capacity_bytes)
    except Exception:
        vmem_cap = 64 * 1024 * 1024

    def vmem_est(lt):
        win = C_in * _round_up(off0 + lt + right, 128) * in_bytes
        xc = 2 * C_in * lt * in_bytes                    # center tile, 2 buffers
        xh = 4 * C_in * HB * in_bytes                    # two halo slabs, 2 buffers
        o = 2 * C_out * lt * in_bytes                    # output tile, 2 buffers
        w = 2 * (C_in * K * 4 + C_out * C_in * 2)        # resident weights, 2 buffers
        tmp = 2 * (min(C_in, c_chunk) + C_out) * lt * 4  # f32 accumulators / temps
        return win + xc + xh + o + w + tmp

    if l_tile is None:
        budget = int(vmem_cap * 0.45)
        max_lt = max(HB, min(2048, _round_up(L, HB)))
        l_tile = HB
        cand = HB
        while cand <= max_lt:
            if vmem_est(cand) <= budget:
                l_tile = cand
            cand += HB
    else:
        l_tile = max(HB, _round_up(l_tile, HB))

    if l_tile >= L:
        # Single time tile: use the exact length (full-dim block, no ragged
        # edge); the halo regions degenerate to in-kernel zeros.
        l_tile = L
        T = 1
        multi = False
    else:
        T = pl.cdiv(L, l_tile)
        multi = True

    win_w = _round_up(off0 + l_tile + right, 128)
    vmem_limit = int(min(vmem_cap * 0.8,
                         max(2 * vmem_est(l_tile), 32 * 1024 * 1024)))

    # Weight casts hoisted out of the grid loop (tiny, one-time).
    w_dw_f = w_dw.astype(jnp.float32)
    w_pw_b = w_pw.astype(jnp.bfloat16)

    kernel = functools.partial(
        _tcs_kernel, K=K, dilation=dilation, l_tile=l_tile, L=L, HB=HB,
        left=left, right=right, off0=off0, c_chunk=c_chunk, multi=multi)

    in_specs = [pl.BlockSpec((1, C_in, l_tile), lambda n, t: (n, 0, t))]
    inputs = [x]
    if multi:
        r = l_tile // HB
        n_hb = pl.cdiv(L, HB)
        in_specs += [
            # Left-neighbour slab (covers columns [t*l_tile - HB, t*l_tile)).
            pl.BlockSpec((1, C_in, HB),
                         lambda n, t: (n, 0, jnp.maximum(t * r - 1, 0))),
            # Right-neighbour slab (covers columns [(t+1)*l_tile, ... + HB)).
            pl.BlockSpec((1, C_in, HB),
                         lambda n, t: (n, 0, jnp.minimum((t + 1) * r, n_hb - 1))),
        ]
        inputs += [x, x]
    in_specs += [
        pl.BlockSpec((C_in, K), lambda n, t: (0, 0)),        # depthwise weights
        pl.BlockSpec((C_out, C_in), lambda n, t: (0, 0)),     # pointwise weights
    ]
    inputs += [w_dw_f, w_pw_b]

    out = pl.pallas_call(
        kernel,
        out_shape=jax.ShapeDtypeStruct((N, C_out, L), x.dtype),
        grid_spec=pltpu.PrefetchScalarGridSpec(
            num_scalar_prefetch=0,
            grid=(N, T),
            in_specs=in_specs,
            out_specs=pl.BlockSpec((1, C_out, l_tile), lambda n, t: (n, 0, t)),
            scratch_shapes=[pltpu.VMEM((C_in, win_w), x.dtype)],
        ),
        compiler_params=pltpu.CompilerParams(
            dimension_semantics=("parallel", "parallel"),
            vmem_limit_bytes=vmem_limit),
    )(*inputs)
    return out


def _reference(x, w_dw, w_pw, *, dilation=1):
    """Pure-JAX reference (lax conv) matching the PyTorch forward (f32)."""
    C_in = x.shape[1]
    K = w_dw.shape[1]
    total_pad = dilation * (K - 1)
    left = total_pad // 2
    right = total_pad - left
    y = jax.lax.conv_general_dilated(
        x, w_dw[:, None, :], window_strides=(1,),
        padding=[(left, right)], rhs_dilation=(dilation,),
        dimension_numbers=("NCH", "OIH", "NCH"),
        feature_group_count=C_in)
    y = jax.lax.conv_general_dilated(
        y, w_pw[:, :, None], window_strides=(1,), padding=[(0, 0)],
        dimension_numbers=("NCH", "OIH", "NCH"))
    return y


def _run_case(key, N, C_in, C_out, L, K, dil, l_tile=None, atol=2e-2, rtol=2e-2):
    k_x, k_dw, k_pw = jax.random.split(key, 3)
    x = jax.random.normal(k_x, (N, C_in, L), dtype=jnp.float32)
    w_dw = jax.random.normal(k_dw, (C_in, K), dtype=jnp.float32) * 0.1
    w_pw = jax.random.normal(k_pw, (C_out, C_in), dtype=jnp.float32) * 0.1

    out = jax.block_until_ready(
        time_channel_separable_conv(x, w_dw, w_pw, dilation=dil, l_tile=l_tile))
    ref = jax.block_until_ready(_reference(x, w_dw, w_pw, dilation=dil))

    assert out.shape == (N, C_out, L), out.shape
    # Tolerance loosened because the pointwise matmul runs with bf16 operands
    # (f32 accumulation) on the MXU.
    assert jnp.allclose(out, ref, atol=atol, rtol=rtol), (
        float(jnp.max(jnp.abs(out - ref))))


if __name__ == "__main__":
    key = jax.random.PRNGKey(0)
    k1, k2, k3 = jax.random.split(key, 3)

    # Case 1: small shapes from the module (single time tile, exact-L path).
    _run_case(k1, N=2, C_in=8, C_out=16, L=16, K=3, dil=2)

    # Case 2: multi-tile path with a ragged last tile — exercises in-kernel
    # halo slabs, iota masking for 'same' padding, and clipped edge DMAs.
    _run_case(k2, N=2, C_in=12, C_out=20, L=300, K=5, dil=3, l_tile=128)

    # Case 3: multi-tile path with L an exact multiple of l_tile.
    _run_case(k3, N=1, C_in=16, C_out=8, L=256, K=3, dil=1, l_tile=128)

    print("KERNEL_OK")
</pallas_src>

<mosaic_0001>
module attributes {stable_mosaic.version = 11 : i64} {
  func.func @_tcs_kernel(%arg0: i32, %arg1: i32, %arg2: memref<1x8x16xf32, #tpu.memory_space<vmem>>, %arg3: memref<8x3xf32, #tpu.memory_space<vmem>>, %arg4: memref<16x8xbf16, #tpu.memory_space<vmem>>, %arg5: memref<1x16x16xf32, #tpu.memory_space<vmem>>, %arg6: memref<8x256xf32, #tpu.memory_space<vmem>>) attributes {dimension_semantics = [#tpu.dimension_semantics<parallel>, #tpu.dimension_semantics<parallel>], iteration_bounds = array<i64: 2, 1>, scalar_prefetch = 0 : i64, scratch_operands = 1 : i64, tpu.core_type = #tpu.core_type<tc>, window_params = [{transform_indices = @transform_0, window_bounds = array<i64: 1, 8, 16>}, {pipeline_mode = #tpu.pipeline_mode<synchronous>, transform_indices = @transform_1, window_bounds = array<i64: 8, 3>}, {pipeline_mode = #tpu.pipeline_mode<synchronous>, transform_indices = @transform_2, window_bounds = array<i64: 16, 8>}, {transform_indices = @transform_3, window_bounds = array<i64: 1, 16, 16>}]} {
    %c0 = arith.constant 0 : index
    %c0_0 = arith.constant 0 : index
    %c0_1 = arith.constant 0 : index
    %0 = vector.load %arg2[%c0, %c0_0, %c0_1] : memref<1x8x16xf32, #tpu.memory_space<vmem>>, vector<1x8x16xf32>
    %1 = vector.shape_cast %0 : vector<1x8x16xf32> to vector<8x16xf32>
    %c0_2 = arith.constant 0 : index
    %c128 = arith.constant 128 : index
    %2 = vector.load %arg6[%c0_2, %c128] : memref<8x256xf32, #tpu.memory_space<vmem>>, vector<8x16xf32>
    tpu.vector_store %arg6[%c0_2, %c128], %1 {strides = array<i32>} : memref<8x256xf32, #tpu.memory_space<vmem>>, vector<8x16xf32>,
    %cst = arith.constant 0.000000e+00 : f32
    %3 = vector.broadcast %cst : f32 to vector<8x2xf32>
    %c0_3 = arith.constant 0 : index
    %c126 = arith.constant 126 : index
    %4 = vector.load %arg6[%c0_3, %c126] : memref<8x256xf32, #tpu.memory_space<vmem>>, vector<8x2xf32>
    tpu.vector_store %arg6[%c0_3, %c126], %3 {strides = array<i32>} : memref<8x256xf32, #tpu.memory_space<vmem>>, vector<8x2xf32>,
    %cst_4 = arith.constant 0.000000e+00 : f32
    %5 = vector.broadcast %cst_4 : f32 to vector<8x2xf32>
    %c0_5 = arith.constant 0 : index
    %c144 = arith.constant 144 : index
    %6 = vector.load %arg6[%c0_5, %c144] : memref<8x256xf32, #tpu.memory_space<vmem>>, vector<8x2xf32>
    tpu.vector_store %arg6[%c0_5, %c144], %5 {strides = array<i32>} : memref<8x256xf32, #tpu.memory_space<vmem>>, vector<8x2xf32>,
    %c0_6 = arith.constant 0 : index
    %c0_7 = arith.constant 0 : index
    %7 = vector.load %arg3[%c0_6, %c0_7] : memref<8x3xf32, #tpu.memory_space<vmem>>, vector<8x1xf32>
    %c0_8 = arith.constant 0 : index
    %c126_9 = arith.constant 126 : index
    %8 = vector.load %arg6[%c0_8, %c126_9] : memref<8x256xf32, #tpu.memory_space<vmem>>, vector<8x16xf32>
    %9 = vector.broadcast %7 : vector<8x1xf32> to vector<8x16xf32>
    %10 = arith.mulf %9, %8 : vector<8x16xf32>
    %c0_10 = arith.constant 0 : index
    %c1 = arith.constant 1 : index
    %11 = vector.load %arg3[%c0_10, %c1] : memref<8x3xf32, #tpu.memory_space<vmem>>, vector<8x1xf32>
    %c0_11 = arith.constant 0 : index
    %c128_12 = arith.constant 128 : index
    %12 = vector.load %arg6[%c0_11, %c128_12] : memref<8x256xf32, #tpu.memory_space<vmem>>, vector<8x16xf32>
    %13 = vector.broadcast %11 : vector<8x1xf32> to vector<8x16xf32>
    %14 = arith.mulf %13, %12 : vector<8x16xf32>
    %15 = arith.addf %10, %14 : vector<8x16xf32>
    %c0_13 = arith.constant 0 : index
    %c2 = arith.constant 2 : index
    %16 = vector.load %arg3[%c0_13, %c2] : memref<8x3xf32, #tpu.memory_space<vmem>>, vector<8x1xf32>
    %c0_14 = arith.constant 0 : index
    %c130 = arith.constant 130 : index
    %17 = vector.load %arg6[%c0_14, %c130] : memref<8x256xf32, #tpu.memory_space<vmem>>, vector<8x16xf32>
    %18 = vector.broadcast %16 : vector<8x1xf32> to vector<8x16xf32>
    %19 = arith.mulf %18, %17 : vector<8x16xf32>
    %20 = arith.addf %15, %19 : vector<8x16xf32>
    %c0_15 = arith.constant 0 : index
    %c0_16 = arith.constant 0 : index
    %21 = vector.load %arg4[%c0_15, %c0_16] : memref<16x8xbf16, #tpu.memory_space<vmem>>, vector<16x8xbf16>
    %22 = arith.truncf %20 : vector<8x16xf32> to vector<8x16xbf16>
    %cst_17 = arith.constant dense<0.000000e+00> : vector<16x16xf32>
    %23 = tpu.matmul %21, %22, %cst_17 {dimension_numbers = #tpu.dot_dimension_numbers<[1], [0], [0], [1], [0, 0, 1, 1], [], []>} : vector<16x8xbf16>, vector<8x16xbf16>, vector<16x16xf32> -> vector<16x16xf32>
    %c0_18 = arith.constant 0 : index
    %c0_19 = arith.constant 0 : index
    %c0_20 = arith.constant 0 : index
    %24 = vector.load %arg5[%c0_18, %c0_19, %c0_20] : memref<1x16x16xf32, #tpu.memory_space<vmem>>, vector<1x16x16xf32>
    %25 = vector.shape_cast %24 : vector<1x16x16xf32> to vector<16x16xf32>
    %26 = vector.shape_cast %23 : vector<16x16xf32> to vector<1x16x16xf32>
    tpu.vector_store %arg5[%c0_18, %c0_19, %c0_20], %26 {strides = array<i32>} : memref<1x16x16xf32, #tpu.memory_space<vmem>>, vector<1x16x16xf32>,
    return
  }
  func.func @transform_0(%arg0: i32, %arg1: i32) -> (i32, i32, i32) {
    %c0_i32 = arith.constant 0 : i32
    %c0_i32_0 = arith.constant 0 : i32
    return %arg0, %c0_i32, %arg1 : i32, i32, i32
  }
  func.func @transform_1(%arg0: i32, %arg1: i32) -> (i32, i32) {
    %c0_i32 = arith.constant 0 : i32
    %c0_i32_0 = arith.constant 0 : i32
    %c0_i32_1 = arith.constant 0 : i32
    return %c0_i32, %c0_i32_0 : i32, i32
  }
  func.func @transform_2(%arg0: i32, %arg1: i32) -> (i32, i32) {
    %c0_i32 = arith.constant 0 : i32
    %c0_i32_0 = arith.constant 0 : i32
    %c0_i32_1 = arith.constant 0 : i32
    return %c0_i32, %c0_i32_0 : i32, i32
  }
  func.func @transform_3(%arg0: i32, %arg1: i32) -> (i32, i32, i32) {
    %c0_i32 = arith.constant 0 : i32
    %c0_i32_0 = arith.constant 0 : i32
    return %arg0, %c0_i32, %arg1 : i32, i32, i32
  }
}

</mosaic_0001>

<bundles_post_ra>
// kernel: tpu_custom_call.1
= control target key start
LH: loop header
LB: loop body
LE: loop exit
PB: predicated region body
PF: predicated region fallthrough
CT: control target
= control target key end

     0   :  { %8 = vsyncpa [#allocation4], 0  ;;  %s713_s0 = inlined_call_operand.vmem [shape: f32[2,8,16], index: 0, kind: input, shape index: {}]   ;;  %s714_s1 = inlined_call_operand.vmem [shape: f32[8,3], index: 1, kind: input, shape index: {}]   ;;  %s715_s2 = inlined_call_operand.vmem [shape: bf16[16,8], index: 2, kind: input, shape index: {}]   ;;  %s716_s3 = inlined_call_operand.hbm [shape: f32[2,16,16], index: 3, kind: output, shape index: {}]  }
   0x1   :  { %10 = vsyncpa [#allocation4 + $0x1], 0  ;;  %s590_s12 = smov 0   ;;  %s592_s13 = smov 0  }
   0x2   :  { %s594_s14 = smov 0   ;;  %s596_s15 = smov 0  }
   0x3   :  { %s598_s16 = smov 0   ;;  %s600_s17 = smov 0  }
   0x4 LB: > { %s389_s18 = sadd.s32 4294967295, %s557_s17   ;;  %s390_s19 = sadd.s32 4294967294, %s557_s17   ;;  %s557_s17 = sphi %s600_s17, %s16_s17   ;;  %s553_s16 = sphi %s598_s16, %s723_s16   ;;  %s549_s15 = sphi %s596_s15, %s722_s15   ;;  %s545_s14 = sphi %s594_s14, %s721_s14   ;;  %s541_s13 = sphi %s592_s13, %s720_s13   ;;  %s537_s12 = sphi %s590_s12, %s719_s12  }
   0x5   : > { %s28_s20 = sadd.s32 1, %s553_s16  ;;  %s107_s21 = sadd.s32 1, %s545_s14 }
   0x6   : > { %p30_p0 = scmp.ge.s32.totalorder %s28_s20, 2  ;;  %p117_p1 = scmp.ne.s32.totalorder %s545_s14, %s541_s13 }
   0x7   : > { %p118_p2 = scmp.eq.s32.totalorder %s389_s18, 1  ;;  %p123_p3 = scmp.ne.s32.totalorder %s541_s13, %s537_s12 }
   0x8   : > { %s725_s20 = smov (%p30_p0, %s28_s20), 0  ;;  %p124_p5 = scmp.eq.s32.totalorder %s390_s19, 1 }
   0x9   : > { %p630_p4 = por %p118_p2, %p117_p1  ;;  %s102_s23 = ssub.s32 %s553_s16, %s725_s20 }
   0xa   : > { %p393_p6 = scmp.ge.s32.totalorder %s557_s17, 1  ;;  %p105_p7 = scmp.eq.s32.totalorder %s102_s23, 0 }
   0xb   : > { %p637_p8 = por %p124_p5, %p123_p3  ;;  %p158_p9 = scmp.lt.s32.totalorder %s557_s17, 3 }
   0xc   : > { %s643_s25 = scalar_select %p105_p7, %s545_s14, %s107_s21  }
   0xd   : > { %p159_p10 = pnand %p393_p6, %p158_p9 }
   0xe   : > { %p184_p11 = scmp.lt.s32.totalorder (!%p159_p10), %s549_s15, 1  ;;  %s563_s6 = smov (!%p159_p10), 126  }
   0xf   : > { %162 = sbr.rel (%p159_p10) target bundleno = 604 (0x25c), region = 32  ;;  %s564_s7 = smov (!%p159_p10), 124  }
  0x10   : > { %s566_s8 = smov (!%p159_p10), 2   ;;  %s181_s11 = sand.u32 (!%p159_p10), 1, %s541_s13  }
  0x11   : > { %s394_s18 = sshll.u32 (!%p159_p10), %s181_s11, 4  ;;  %s403_s23 = sshll.u32 (!%p159_p10), %s549_s15, 8 }
  0x12   : > { %s183_s19 = scalar_lea.vmem (!%p159_p10), [#allocation3], %s394_s18  ;;  %s567_s30 = smov (!%p159_p10), [#allocation3]  }
  0x13   : > { %s314_s21 = sshll.u32 (!%p159_p10), %s183_s19, 4  ;;  %s485_s4 = sshll.u32 (!%p159_p10), %s567_s30, 4  ;;  %s660_s21 = int_to_ptr.vmem [resolvable:$true] %s314_s21  ;;  %s486_s4 = int_to_ptr.vmem [resolvable:$false] %s485_s4 }
  0x14   : > { %v199_v0 = vld [vmem:[%s714_s1] sm:$0xff]  ;;  %v559_v1 = vmov 1   ;;  %v560_v2 = vmov 0   ;;  %s185_s28 = scalar_select %p184_p11, %s549_s15, 1  ;;  %v561_v3 = vmov 0.0   ;;  %vm193_vm0 = vcmask 130048  }
  0x15   : > { %477 = vset.pattern.permute.xlu0 %v559_v1  ;;  %479 = vset.pattern.permute.xlu1 %v560_v2  ;;  %vm197_vm1 = vcmask 146560   ;;  %vm195_vm2 = vcmask 1048560   ;;  %v562_v4 = vmov 2   ;;  %vm565_vm3 = vmmov 0   ;;  %v480_v27 = vld [vmem:[%s715_s2] sm:$0xff]   ;;  %s481_s15 = scalar_lea.vmem %s660_s21, 256  ;;  %p488_p1 = scmp.lt.s32.totalorder %s660_s21, %s486_s4 }
  0x16   : > { %210 = vperm.xlu0 %477, %v199_v0   ;;  %204 = vperm.xlu1 %479, %v199_v0   ;;  %s395_s29 = sshll.u32 %s185_s28, 3  ;;  %196 = vst.msk [vmem:[#allocation2] sm:$0xff] %vm195_vm2, %v561_v3  ;;  %vm246_vm4 = vcmask 15360   ;;  %vm252_vm5 = vcmask 1043456   ;;  %vm248_vm6 = vcmask 64512   ;;  %s665_s28 = scalar_lea.hbm %s716_s3, %s403_s23 }
  0x17   : > { %406 = vmatprep.subr.bf16.mxu0 %v561_v3  ;;  %s190_s5 = scalar_lea.vmem %s713_s0, %s395_s29  ;;  %408 = vmatprep.mubr.msk.bf16.mxu0 %vm565_vm3, %v561_v3  ;;  %s668_s29 = scalar_lea.sflag [#allocation4], %s181_s11 }
  0x18   : > { %v192_v5 = vld [vmem:[%s190_s5] sm:$0xff]  ;;  %p482_p12 = scmp.ne.s32.totalorder %s660_s21, %s481_s15  ;;  %s487_s5 = scalar_lea.vmem %s486_s4, 512 }
  0x19   : > { %194 = vst.msk [vmem:[#allocation2 + $0x8] sm:$0xff] %vm193_vm0, %v192_v5  ;;  %p489_p2 = scmp.lt.s32.totalorder %s487_s5, %s481_s15 }
  0x1a   : > { %478 = vset.pattern.permute.xlu0 %v562_v4  ;;  %198 = vst.msk [vmem:[#allocation2 + $0x8] sm:$0xff] %vm197_vm1, %v561_v3  ;;  %p483_p13 = pnand %p482_p12, %p630_p4 }
  0x1b   : > { %221 = vperm.xlu0 %478, %v199_v0   ;;  %p490_p3 = por %p489_p2, %p488_p1 }
  0x1c   : > { %p484_p0 = pneg %p483_p13 }
  0x1d   : > { %v200_v12 = vld [vmem:[#allocation2] sm:$0xff] }
  0x1e   : > { %p491_p5 = pnand %p490_p3, %p484_p0 }
  0x21   : > { %v201_v6 = vld [vmem:[#allocation2 + $0x8] sm:$0xff] }
  0x91   : > { %v211_v7 = vpop.permute.xlu0 %210  ;;  %v205_v11 = vpop.permute.xlu1 %204 }
  0x92   : > { %v213_v8 = vmul.f32 %v211_v7, %v201_v6  ;;  %v207_v13 = vmul.f32 %v205_v11, %v200_v12  ;;  %v208_v14 = vmul.f32 %v205_v11, %v201_v6 }
  0x94   : > { %215 = vrot.lane.b32.xlu1 %v213_v8, %s563_s6 }
  0x96   : > { %v222_v9 = vpop.permute.xlu0 %221 }
  0x97   : > { %v224_v10 = vmul.f32 %v222_v9, %v201_v6 }
  0x99   : > { %226 = vrot.lane.b32.xlu1 %v224_v10, %s564_s7 }
 0x106   : > { %v216_v15 = vpop.permute.xlu1 %215 }
 0x107   : > { %v218_v16 = vadd.f32 %v216_v15, %v207_v13  ;;  %v219_v17 = vadd.f32 %v216_v15, %v208_v14 }
 0x10b   : > { %v227_v18 = vpop.permute.xlu1 %226 }
 0x10c   : > { %v229_v19 = vadd.f32 %v227_v18, %v218_v16  ;;  %v230_v20 = vadd.f32 %v227_v18, %v219_v17 }
 0x10e   : > { %v233_v21 = vpack.c.bf16 %v229_v19, %v229_v19  ;;  %v234_v22 = vpack.c.bf16 %v230_v20, %v230_v20 }
 0x110   : > { %242 = vrot.lane.b32.xlu0 %v233_v21, %s566_s8  ;;  %244 = vrot.lane.b32.xlu1 %v234_v22, %s566_s8 }
 0x182   : > { %v243_v23 = vpop.permute.xlu0 %242  ;;  %v245_v24 = vpop.permute.xlu1 %244 }
 0x183   : > { %v247_v25 = vsel %vm246_vm4, %v243_v23, %v245_v24 }
 0x184   : > { %v254_v26 = vsel %vm252_vm5, %v247_v25, 0 }
 0x185   : > { %407 = vmatpush3.bf16.msra.mxu0 %v254_v26 }
 0x188   : > { %409 = vmatmul.mubr.msk.bf16.vlgmr.msra.gmra.mxu0 %vm248_vm6, %v480_v27 }
 0x248   : > { %v290_v28 = vpop.f32.mrf.mxu0 }
 0x249   : > { %297 = vst.msk [vmem:[%s183_s19] sm:$0xff] %vm193_vm0, %v290_v28 }
 0x24a   : > { %v410_v29 = vpop.f32.mrf.mxu0 }
 0x24c   : > { %v293_v30 = vpop.f32.mrf.mxu0 }
 0x24d   : > { %298 = vst.msk [vmem:[%s183_s19 + $0x8] sm:$0xff] %vm193_vm0, %v293_v30 }
 0x24e   : > { %v411_v31 = vpop.f32.mrf.mxu0 }
 0x24f   : > { %494 = shalt.err (!%p491_p5)
}
 0x250   : > { %s495_s6 = scalar_lea.hbm %s665_s28, 256  ;;  %s499_s9 = scalar_lea.hbm %s716_s3, 512 }
 0x251   : > { %p496_p6 = scmp.ne.s32.totalorder %s665_s28, %s495_s6  ;;  %p500_p10 = scmp.lt.s32.totalorder %s665_s28, %s716_s3 }
 0x252   : > { %p501_p11 = scmp.lt.s32.totalorder %s499_s9, %s495_s6 }
 0x253   : > { %p497_p7 = pnand %p496_p6, %p630_p4 }
 0x254   : > { %p502_p12 = por %p501_p11, %p500_p10 }
 0x255   : > { %p498_p9 = pneg %p497_p7 }
 0x257   : > { %p503_p13 = pnand %p502_p12, %p498_p9 }
 0x259   : > { %506 = shalt.err (!%p503_p13)
}
 0x25a   : > { %s568_s18 = smov 128   ;;  %s569_s19 = smov 8  }
 0x25b   : > { %412 = dma.vmem_to_hbm [thread:$0]  (%p630_p4), %s660_s21, 256, %s665_s28, %s668_s29, %s568_s18, %s568_s18, %s569_s19  }
 0x25c PF: > { %p418_p0 = scmp.ge.s32.totalorder %s557_s17, 2  ;;  %s329_s23 = sand.u32 1, %s537_s12  }
 0x25d   : > { %s330_s26 = scalar_lea.sflag [#allocation4], %s329_s23 }
 0x25e   : > { %p415_p1 = pnand %p418_p0, %p637_p8 }
 0x260   : > { %p416_p2 = pneg %p415_p1 }
 0x262   : > { %532 = dma.done.wait (%p416_p2), %s330_s26, 256  }
 0x263   : > { %534 = vsyncadd (%p416_p2), %s330_s26, 4294967040  ;;  %s16_s17 = sadd.s32 1, %s557_s17   ;;  %s719_s12 = smov %s541_s13 }
 0x264   : > { %p13_p3 = scmp.ge.s32.totalorder %s16_s17, 4   ;;  %s720_s13 = smov %s545_s14 }
 0x265   : > { %s721_s14 = smov %s643_s25  ;;  %s722_s15 = smov %s553_s16 }
 0x266   : > { %s723_s16 = smov %s725_s20  ;;  %15 = sbr.rel (!%p13_p3) target bundleno = 4 (0x4), region = 67 }
 0x26b   :  { %335 = vsyncpa [#allocation4], 1 }
 0x26c   :  { %337 = vsyncpa [#allocation4 + $0x1], 1 }

</bundles_post_ra>
